<compile_context>
chip_gen: v5e
topology: v5e:2x2
jax: 0.10.0
libtpu: 0.0.40
codegen_flags: <defaults>
</compile_context>

<pallas_src>
import functools

import jax
import jax.numpy as jnp
from jax.experimental import pallas as pl
from jax.experimental.pallas import tpu as pltpu

# ---------------- configuration (small synthetic shapes) ----------------
B = 2              # batch
N_TOKENS = 16      # number of patch tokens
IN_DIM = 64        # PatchMLP in_dim
OUT_DIM = 32       # PatchMLP out_dim (== MLP hidden_dim)
LN_EPS = 1e-5      # nn.LayerNorm default


# ---------------- math helpers (shared by kernel and reference) ----------------
def _ln(x, w, b, eps=LN_EPS):
    mu = jnp.mean(x, axis=-1, keepdims=True)
    xc = x - mu
    var = jnp.mean(xc * xc, axis=-1, keepdims=True)
    return xc * jax.lax.rsqrt(var + eps) * w + b


def _gelu(x):
    # exact (erf) GELU, matching torch.nn.GELU() default
    return 0.5 * x * (1.0 + jax.lax.erf(x * 0.7071067811865476))


# ---------------- fused Pallas kernel ----------------
def patch_mlp_kernel(x_ref, w1_ref, b1_ref, w2_ref, b2_ref,
                     ln2w_ref, ln2b_ref, o_ref):
    x = x_ref[...]                                   # (TM, in_dim)

    # LN1: normalize only — affine folded into (w1', b1') wrapper-side.
    mu = jnp.mean(x, axis=-1, keepdims=True)
    xc = x - mu
    var = jnp.mean(xc * xc, axis=-1, keepdims=True)
    h = xc * jax.lax.rsqrt(var + LN_EPS)

    m = jnp.dot(h, w1_ref[...],
                preferred_element_type=jnp.float32) + b1_ref[...]   # fc1 (+LN1 affine)
    m = _gelu(m)                                                    # act_fn
    m = jnp.dot(m, w2_ref[...],
                preferred_element_type=jnp.float32) + b2_ref[...]   # fc2

    o_ref[...] = _ln(m, ln2w_ref[...], ln2b_ref[...])   # PatchMLP.layer_norm


# ---------------- wrapper ----------------
def patch_mlp(patch_features, params, *, tm_max=256):
    b, n, d_in = patch_features.shape
    d_out = params["w2"].shape[1]
    m = b * n

    # fold batch + tokens into the matmul M dimension
    x2d = patch_features.reshape(m, d_in)

    # --- fold LN1 affine into fc1 (one-time, O(d_in*d_out) wrapper work) ---
    w1p = params["ln1_w"].reshape(d_in, 1) * params["w1"]
    b1p = params["ln1_b"].reshape(1, d_in) @ params["w1"] + params["b1"]

    # --- M tiling: TM multiple of 8 (or full extent), weights stay resident ---
    if m % 8 == 0:
        tm = min(m, tm_max)
        tm -= tm % 8
        tm = max(tm, 8)
    else:
        tm = m                     # full-extent block is always legal
    grid = (pl.cdiv(m, tm),)

    weights = (w1p, b1p, params["w2"], params["b2"],
               params["ln2_w"], params["ln2_b"])

    def const_spec(arr):
        # whole array, same block every grid step -> VMEM-resident, no re-DMA
        return pl.BlockSpec(arr.shape, lambda i: (0,) * arr.ndim)

    # advisory cost hint for XLA's scheduler
    flops = 2 * m * (d_in * d_out + d_out * d_out)
    transcendentals = m * d_out + 2 * m              # erf + rsqrt (LN1, LN2)
    bytes_accessed = 4 * (x2d.size + sum(w.size for w in weights) + m * d_out)

    out2d = pl.pallas_call(
        patch_mlp_kernel,
        out_shape=jax.ShapeDtypeStruct((m, d_out), jnp.float32),
        grid=grid,
        in_specs=[pl.BlockSpec((tm, d_in), lambda i: (i, 0))]
                 + [const_spec(w) for w in weights],
        out_specs=pl.BlockSpec((tm, d_out), lambda i: (i, 0)),
        compiler_params=pltpu.CompilerParams(
            dimension_semantics=("parallel",)),      # shards M across v7x's 2 TCs
        cost_estimate=pl.CostEstimate(flops=flops,
                                      transcendentals=transcendentals,
                                      bytes_accessed=bytes_accessed),
    )(x2d, *weights)

    return out2d.reshape(b, n, d_out)


# ---------------- pure-JAX reference (same math, no Pallas, no folding) ----------------
def patch_mlp_ref(x, p):
    h = _ln(x, p["ln1_w"], p["ln1_b"])
    m = jnp.dot(h, p["w1"]) + p["b1"]
    m = _gelu(m)
    m = jnp.dot(m, p["w2"]) + p["b2"]
    return _ln(m, p["ln2_w"], p["ln2_b"])


# ---------------- deterministic parameter init ----------------
def init_params(key):
    keys = iter(jax.random.split(key, 8))

    def nrm(shape, scale=0.02):
        return scale * jax.random.normal(next(keys), shape, dtype=jnp.float32)

    # LN weights perturbed away from (1, 0) so the affine-folding path is
    # actually exercised by the correctness check.
    return dict(
        ln1_w=1.0 + nrm((1, IN_DIM), 0.1),
        ln1_b=nrm((1, IN_DIM), 0.05),
        w1=nrm((IN_DIM, OUT_DIM)),
        b1=nrm((1, OUT_DIM), 0.01),
        w2=nrm((OUT_DIM, OUT_DIM)),
        b2=nrm((1, OUT_DIM), 0.01),
        ln2_w=1.0 + nrm((1, OUT_DIM), 0.1),
        ln2_b=nrm((1, OUT_DIM), 0.05),
    )


if __name__ == "__main__":
    key = jax.random.PRNGKey(0)
    params = init_params(key)
    x = jax.random.normal(jax.random.fold_in(key, 123),
                          (B, N_TOKENS, IN_DIM), dtype=jnp.float32)

    ref = patch_mlp_ref(x, params)

    # default path (single M block at these toy sizes)
    out = jax.jit(patch_mlp)(x, params)
    jax.block_until_ready(out)
    assert out.shape == (B, N_TOKENS, OUT_DIM), out.shape
    assert bool(jnp.all(jnp.isfinite(out)))
    max_err = float(jnp.max(jnp.abs(out - ref)))
    assert max_err < 1e-2, max_err

    # multi-step parallel-M grid path (structure that shards across v7x's 2 TCs)
    out_g = jax.jit(functools.partial(patch_mlp, tm_max=16))(x, params)
    jax.block_until_ready(out_g)
    max_err_g = float(jnp.max(jnp.abs(out_g - ref)))
    assert max_err_g < 1e-2, max_err_g

    print("KERNEL_OK")
</pallas_src>

<mosaic_0001>
module attributes {stable_mosaic.version = 11 : i64} {
  func.func @patch_mlp_kernel(%arg0: i32, %arg1: memref<32x64xf32, #tpu.memory_space<vmem>>, %arg2: memref<64x32xf32, #tpu.memory_space<vmem>>, %arg3: memref<1x32xf32, #tpu.memory_space<vmem>>, %arg4: memref<32x32xf32, #tpu.memory_space<vmem>>, %arg5: memref<1x32xf32, #tpu.memory_space<vmem>>, %arg6: memref<1x32xf32, #tpu.memory_space<vmem>>, %arg7: memref<1x32xf32, #tpu.memory_space<vmem>>, %arg8: memref<32x32xf32, #tpu.memory_space<vmem>>) attributes {dimension_semantics = [#tpu.dimension_semantics<parallel>], iteration_bounds = array<i64: 1>, scalar_prefetch = 0 : i64, scratch_operands = 0 : i64, tpu.core_type = #tpu.core_type<tc>, window_params = [{transform_indices = @transform_0, window_bounds = array<i64: 32, 64>}, {pipeline_mode = #tpu.pipeline_mode<synchronous>, transform_indices = @transform_1, window_bounds = array<i64: 64, 32>}, {pipeline_mode = #tpu.pipeline_mode<synchronous>, transform_indices = @transform_2, window_bounds = array<i64: 1, 32>}, {pipeline_mode = #tpu.pipeline_mode<synchronous>, transform_indices = @transform_3, window_bounds = array<i64: 32, 32>}, {pipeline_mode = #tpu.pipeline_mode<synchronous>, transform_indices = @transform_4, window_bounds = array<i64: 1, 32>}, {pipeline_mode = #tpu.pipeline_mode<synchronous>, transform_indices = @transform_5, window_bounds = array<i64: 1, 32>}, {pipeline_mode = #tpu.pipeline_mode<synchronous>, transform_indices = @transform_6, window_bounds = array<i64: 1, 32>}, {transform_indices = @transform_7, window_bounds = array<i64: 32, 32>}]} {
    %c0 = arith.constant 0 : index
    %c0_0 = arith.constant 0 : index
    %0 = vector.load %arg1[%c0, %c0_0] : memref<32x64xf32, #tpu.memory_space<vmem>>, vector<32x64xf32>
    %cst = arith.constant dense<0.000000e+00> : vector<32xf32>
    %1 = vector.multi_reduction <add>, %0, %cst [1] : vector<32x64xf32> to vector<32xf32>
    %2 = vector.shape_cast %1 : vector<32xf32> to vector<32x1xf32>
    %cst_1 = arith.constant 6.400000e+01 : f32
    %3 = vector.broadcast %cst_1 : f32 to vector<32x1xf32>
    %4 = arith.divf %2, %3 : vector<32x1xf32>
    %5 = vector.broadcast %4 : vector<32x1xf32> to vector<32x64xf32>
    %6 = arith.subf %0, %5 : vector<32x64xf32>
    %7 = arith.mulf %6, %6 : vector<32x64xf32>
    %cst_2 = arith.constant dense<0.000000e+00> : vector<32xf32>
    %8 = vector.multi_reduction <add>, %7, %cst_2 [1] : vector<32x64xf32> to vector<32xf32>
    %9 = vector.shape_cast %8 : vector<32xf32> to vector<32x1xf32>
    %cst_3 = arith.constant 6.400000e+01 : f32
    %10 = vector.broadcast %cst_3 : f32 to vector<32x1xf32>
    %11 = arith.divf %9, %10 : vector<32x1xf32>
    %cst_4 = arith.constant 9.99999974E-6 : f32
    %12 = vector.broadcast %cst_4 : f32 to vector<32x1xf32>
    %13 = arith.addf %11, %12 : vector<32x1xf32>
    %14 = math.rsqrt %13 : vector<32x1xf32>
    %15 = vector.broadcast %14 : vector<32x1xf32> to vector<32x64xf32>
    %16 = arith.mulf %6, %15 : vector<32x64xf32>
    %c0_5 = arith.constant 0 : index
    %c0_6 = arith.constant 0 : index
    %17 = vector.load %arg2[%c0_5, %c0_6] : memref<64x32xf32, #tpu.memory_space<vmem>>, vector<64x32xf32>
    %cst_7 = arith.constant dense<0.000000e+00> : vector<32x32xf32>
    %18 = tpu.matmul %16, %17, %cst_7 {dimension_numbers = #tpu.dot_dimension_numbers<[1], [0], [0], [1], [0, 0, 1, 1], [], []>} : vector<32x64xf32>, vector<64x32xf32>, vector<32x32xf32> -> vector<32x32xf32>
    %c0_8 = arith.constant 0 : index
    %c0_9 = arith.constant 0 : index
    %19 = vector.load %arg3[%c0_8, %c0_9] : memref<1x32xf32, #tpu.memory_space<vmem>>, vector<1x32xf32>
    %20 = vector.broadcast %19 : vector<1x32xf32> to vector<32x32xf32>
    %21 = arith.addf %18, %20 : vector<32x32xf32>
    %cst_10 = arith.constant 5.000000e-01 : f32
    %22 = vector.broadcast %cst_10 : f32 to vector<32x32xf32>
    %23 = arith.mulf %22, %21 : vector<32x32xf32>
    %cst_11 = arith.constant 0.707106769 : f32
    %24 = vector.broadcast %cst_11 : f32 to vector<32x32xf32>
    %25 = arith.mulf %21, %24 : vector<32x32xf32>
    %26 = math.erf %25 : vector<32x32xf32>
    %cst_12 = arith.constant 1.000000e+00 : f32
    %27 = vector.broadcast %cst_12 : f32 to vector<32x32xf32>
    %28 = arith.addf %27, %26 : vector<32x32xf32>
    %29 = arith.mulf %23, %28 : vector<32x32xf32>
    %c0_13 = arith.constant 0 : index
    %c0_14 = arith.constant 0 : index
    %30 = vector.load %arg4[%c0_13, %c0_14] : memref<32x32xf32, #tpu.memory_space<vmem>>, vector<32x32xf32>
    %cst_15 = arith.constant dense<0.000000e+00> : vector<32x32xf32>
    %31 = tpu.matmul %29, %30, %cst_15 {dimension_numbers = #tpu.dot_dimension_numbers<[1], [0], [0], [1], [0, 0, 1, 1], [], []>} : vector<32x32xf32>, vector<32x32xf32>, vector<32x32xf32> -> vector<32x32xf32>
    %c0_16 = arith.constant 0 : index
    %c0_17 = arith.constant 0 : index
    %32 = vector.load %arg5[%c0_16, %c0_17] : memref<1x32xf32, #tpu.memory_space<vmem>>, vector<1x32xf32>
    %33 = vector.broadcast %32 : vector<1x32xf32> to vector<32x32xf32>
    %34 = arith.addf %31, %33 : vector<32x32xf32>
    %c0_18 = arith.constant 0 : index
    %c0_19 = arith.constant 0 : index
    %35 = vector.load %arg6[%c0_18, %c0_19] : memref<1x32xf32, #tpu.memory_space<vmem>>, vector<1x32xf32>
    %c0_20 = arith.constant 0 : index
    %c0_21 = arith.constant 0 : index
    %36 = vector.load %arg7[%c0_20, %c0_21] : memref<1x32xf32, #tpu.memory_space<vmem>>, vector<1x32xf32>
    %cst_22 = arith.constant dense<0.000000e+00> : vector<32xf32>
    %37 = vector.multi_reduction <add>, %34, %cst_22 [1] : vector<32x32xf32> to vector<32xf32>
    %38 = vector.shape_cast %37 : vector<32xf32> to vector<32x1xf32>
    %cst_23 = arith.constant 3.200000e+01 : f32
    %39 = vector.broadcast %cst_23 : f32 to vector<32x1xf32>
    %40 = arith.divf %38, %39 : vector<32x1xf32>
    %41 = vector.broadcast %40 : vector<32x1xf32> to vector<32x32xf32>
    %42 = arith.subf %34, %41 : vector<32x32xf32>
    %43 = arith.mulf %42, %42 : vector<32x32xf32>
    %cst_24 = arith.constant dense<0.000000e+00> : vector<32xf32>
    %44 = vector.multi_reduction <add>, %43, %cst_24 [1] : vector<32x32xf32> to vector<32xf32>
    %45 = vector.shape_cast %44 : vector<32xf32> to vector<32x1xf32>
    %cst_25 = arith.constant 3.200000e+01 : f32
    %46 = vector.broadcast %cst_25 : f32 to vector<32x1xf32>
    %47 = arith.divf %45, %46 : vector<32x1xf32>
    %cst_26 = arith.constant 9.99999974E-6 : f32
    %48 = vector.broadcast %cst_26 : f32 to vector<32x1xf32>
    %49 = arith.addf %47, %48 : vector<32x1xf32>
    %50 = math.rsqrt %49 : vector<32x1xf32>
    %51 = vector.broadcast %50 : vector<32x1xf32> to vector<32x32xf32>
    %52 = arith.mulf %42, %51 : vector<32x32xf32>
    %53 = vector.broadcast %35 : vector<1x32xf32> to vector<32x32xf32>
    %54 = arith.mulf %52, %53 : vector<32x32xf32>
    %55 = vector.broadcast %36 : vector<1x32xf32> to vector<32x32xf32>
    %56 = arith.addf %54, %55 : vector<32x32xf32>
    %c0_27 = arith.constant 0 : index
    %c0_28 = arith.constant 0 : index
    %57 = vector.load %arg8[%c0_27, %c0_28] : memref<32x32xf32, #tpu.memory_space<vmem>>, vector<32x32xf32>
    tpu.vector_store %arg8[%c0_27, %c0_28], %56 {strides = array<i32>} : memref<32x32xf32, #tpu.memory_space<vmem>>, vector<32x32xf32>,
    return
  }
  func.func @transform_0(%arg0: i32) -> (i32, i32) {
    %c0_i32 = arith.constant 0 : i32
    %c0_i32_0 = arith.constant 0 : i32
    return %arg0, %c0_i32 : i32, i32
  }
  func.func @transform_1(%arg0: i32) -> (i32, i32) {
    %c0_i32 = arith.constant 0 : i32
    %c0_i32_0 = arith.constant 0 : i32
    %c0_i32_1 = arith.constant 0 : i32
    return %c0_i32, %c0_i32_0 : i32, i32
  }
  func.func @transform_2(%arg0: i32) -> (i32, i32) {
    %c0_i32 = arith.constant 0 : i32
    %c0_i32_0 = arith.constant 0 : i32
    %c0_i32_1 = arith.constant 0 : i32
    return %c0_i32, %c0_i32_0 : i32, i32
  }
  func.func @transform_3(%arg0: i32) -> (i32, i32) {
    %c0_i32 = arith.constant 0 : i32
    %c0_i32_0 = arith.constant 0 : i32
    %c0_i32_1 = arith.constant 0 : i32
    return %c0_i32, %c0_i32_0 : i32, i32
  }
  func.func @transform_4(%arg0: i32) -> (i32, i32) {
    %c0_i32 = arith.constant 0 : i32
    %c0_i32_0 = arith.constant 0 : i32
    %c0_i32_1 = arith.constant 0 : i32
    return %c0_i32, %c0_i32_0 : i32, i32
  }
  func.func @transform_5(%arg0: i32) -> (i32, i32) {
    %c0_i32 = arith.constant 0 : i32
    %c0_i32_0 = arith.constant 0 : i32
    %c0_i32_1 = arith.constant 0 : i32
    return %c0_i32, %c0_i32_0 : i32, i32
  }
  func.func @transform_6(%arg0: i32) -> (i32, i32) {
    %c0_i32 = arith.constant 0 : i32
    %c0_i32_0 = arith.constant 0 : i32
    %c0_i32_1 = arith.constant 0 : i32
    return %c0_i32, %c0_i32_0 : i32, i32
  }
  func.func @transform_7(%arg0: i32) -> (i32, i32) {
    %c0_i32 = arith.constant 0 : i32
    %c0_i32_0 = arith.constant 0 : i32
    return %arg0, %c0_i32 : i32, i32
  }
}

</mosaic_0001>

<bundles_post_ra>
// kernel: patch_mlp.1
= control target key start
LH: loop header
LB: loop body
LE: loop exit
PB: predicated region body
PF: predicated region fallthrough
CT: control target
= control target key end

     0   :  { %vm31_vm0 = vcmask 523264   ;;  %s898_s0 = inlined_call_operand.vmem [shape: f32[32,64], index: 0, kind: input, shape index: {}]   ;;  %s899_s1 = inlined_call_operand.vmem [shape: f32[64,32], index: 1, kind: input, shape index: {}]   ;;  %s900_s2 = inlined_call_operand.vmem [shape: f32[1,32], index: 2, kind: input, shape index: {}]   ;;  %s901_s3 = inlined_call_operand.vmem [shape: f32[32,32], index: 3, kind: input, shape index: {}]   ;;  %s902_s4 = inlined_call_operand.vmem [shape: f32[1,32], index: 4, kind: input, shape index: {}]   ;;  %s903_s5 = inlined_call_operand.vmem [shape: f32[1,32], index: 5, kind: input, shape index: {}]   ;;  %s904_s6 = inlined_call_operand.vmem [shape: f32[1,32], index: 6, kind: input, shape index: {}]   ;;  %s905_s7 = inlined_call_operand.hbm [shape: f32[32,32], index: 7, kind: output, shape index: {}]  }
   0x1   :  { %v29_v0 = vld [vmem:[%s898_s0 + $0x10] sm:$0xff]  ;;  %v27_v1 = vld [vmem:[%s898_s0] sm:$0xff] }
   0x2   :  { %v38_v2 = vsel %vm31_vm0, %v29_v0, 0.0  ;;  %v32_v3 = vsel %vm31_vm0, %v27_v1, 0.0 }
   0x3   :  { %39 = vadd.xlane.f32.xlu1 %v38_v2  ;;  %33 = vadd.xlane.f32.xlu0 %v32_v3 }
   0x4   :  { %12 = vsyncpa [#allocation3], 0  ;;  %v30_v4 = vld [vmem:[%s898_s0 + $0x18] sm:$0xff]  ;;  %v28_v5 = vld [vmem:[%s898_s0 + $0x8] sm:$0xff]  ;;  %v626_v8 = vmov 64.0   ;;  %s527_s14 = sshll.u32 %s905_s7, 4  ;;  %s528_s14 = int_to_ptr.hbm [resolvable:$true] %s527_s14 }
   0x5   :  { %v41_v6 = vsel %vm31_vm0, %v30_v4, 0.0  ;;  %v35_v7 = vsel %vm31_vm0, %v28_v5, 0.0  ;;  %572 = vrcp.f32 %v626_v8  ;;  %v134_v35 = vld [vmem:[%s899_s1 + $0x38] sm:$0xff]  ;;  %v133_v36 = vld [vmem:[%s899_s1 + $0x30] sm:$0xff]  ;;  %v132_v37 = vld [vmem:[%s899_s1 + $0x28] sm:$0xff]  ;;  %s629_s15 = smov 128  }
   0x6   :  { %159 = vmatpush.msra.mxu0 %v134_v35  ;;  %551 = vmatpush.msra.mxu2 %v134_v35  ;;  %v131_v38 = vld [vmem:[%s899_s1 + $0x20] sm:$0xff]  ;;  %v130_v39 = vld [vmem:[%s899_s1 + $0x18] sm:$0xff]  ;;  %v129_v40 = vld [vmem:[%s899_s1 + $0x10] sm:$0xff]  ;;  %s630_s16 = smov 8  }
   0x7   :  { %v128_v41 = vld [vmem:[%s899_s1 + $0x8] sm:$0xff]  ;;  %v127_v42 = vld [vmem:[%s899_s1] sm:$0xff] }
   0x8   :  { %160 = vmatpush.msra.mxu0 %v133_v36  ;;  %552 = vmatpush.msra.mxu2 %v133_v36 }
   0xa   :  { %161 = vmatpush.msra.mxu0 %v132_v37  ;;  %553 = vmatpush.msra.mxu2 %v132_v37 }
   0xb   :  { %42 = vadd.xlane.f32.xlu1 %v41_v6  ;;  %36 = vadd.xlane.f32.xlu0 %v35_v7  ;;  %v573_v9 = vpop.eup %572 }
   0xc   :  { %v45_v10 = vmul.f32 64.0, %v573_v9  ;;  %vm49_vm1 = vweird.f32 %v573_v9  ;;  %162 = vmatpush.msra.mxu0 %v131_v38  ;;  %554 = vmatpush.msra.mxu2 %v131_v38 }
   0xe   :  { %v46_v11 = vsub.f32 1.0, %v45_v10  ;;  %163 = vmatpush.msra.mxu0 %v130_v39  ;;  %555 = vmatpush.msra.mxu2 %v130_v39 }
  0x10   :  { %v47_v12 = vmul.f32 %v573_v9, %v46_v11  ;;  %164 = vmatpush.msra.mxu0 %v129_v40  ;;  %556 = vmatpush.msra.mxu2 %v129_v40 }
  0x12   :  { %v48_v13 = vadd.f32 %v573_v9, %v47_v12  ;;  %165 = vmatpush.msra.mxu0 %v128_v41  ;;  %557 = vmatpush.msra.mxu2 %v128_v41 }
  0x14   :  { %v50_v14 = vsel %vm49_vm1, %v573_v9, %v48_v13  ;;  %166 = vmatpush.msra.mxu0 %v127_v42  ;;  %558 = vmatpush.msra.mxu2 %v127_v42 }
  0x76   :  { %v40_v15 = vpop.xlane.xlu1 %39  ;;  %v34_v16 = vpop.xlane.xlu0 %33 }
  0x77   :  { %v53_v17 = vmul.f32 %v50_v14, %v40_v15  ;;  %v51_v18 = vmul.f32 %v50_v14, %v34_v16 }
  0x79   :  { %v687_v19 = vsub.f32 %v29_v0, %v53_v17  ;;  %v689_v20 = vsub.f32 %v27_v1, %v51_v18 }
  0x7b   :  { %v61_v21 = vmul.f32 %v687_v19, %v687_v19  ;;  %v59_v22 = vmul.f32 %v689_v20, %v689_v20 }
  0x7d   :  { %v69_v23 = vsel %vm31_vm0, %v61_v21, 0.0  ;;  %v63_v24 = vsel %vm31_vm0, %v59_v22, 0.0 }
  0x7e   :  { %v43_v25 = vpop.xlane.xlu1 %42  ;;  %70 = vadd.xlane.f32.xlu0 %v69_v23  ;;  %64 = vadd.xlane.f32.xlu2 %v63_v24  ;;  %v37_v26 = vpop.xlane.xlu0 %36  ;;  %v568_v23 = vld [vmem:[%s900_s2] ss:$0 sm:$0xff] }
  0x7f   :  { %v54_v27 = vmul.f32 %v50_v14, %v43_v25  ;;  %v52_v28 = vmul.f32 %v50_v14, %v37_v26 }
  0x81   :  { %v697_v29 = vsub.f32 %v30_v4, %v54_v27  ;;  %v699_v30 = vsub.f32 %v28_v5, %v52_v28 }
  0x83   :  { %v62_v31 = vmul.f32 %v697_v29, %v697_v29  ;;  %v60_v32 = vmul.f32 %v699_v30, %v699_v30 }
  0x85   :  { %v72_v33 = vsel %vm31_vm0, %v62_v31, 0.0  ;;  %v66_v34 = vsel %vm31_vm0, %v60_v32, 0.0 }
  0x86   :  { %73 = vadd.xlane.f32.xlu1 %v72_v33  ;;  %67 = vadd.xlane.f32.xlu2 %v66_v34 }
  0xf1   :  { %v65_v43 = vpop.xlane.xlu2 %64  ;;  %v71_v44 = vpop.xlane.xlu0 %70 }
  0xf2   :  { %v75_v45 = vmul.f32 %v65_v43, %v50_v14  ;;  %v77_v46 = vmul.f32 %v71_v44, %v50_v14 }
  0xf4   :  { %v79_v47 = vadd.f32 1e-05, %v75_v45  ;;  %v81_v48 = vadd.f32 1e-05, %v77_v46 }
  0xf6   :  { %574 = vrsqrt.f32 %v79_v47  ;;  %vm109_vm3 = vweird.f32 %v81_v48  ;;  %vm89_vm5 = vweird.f32 %v79_v47 }
  0xf7   :  { %576 = vrsqrt.f32 %v81_v48 }
  0xf9   :  { %v74_v49 = vpop.xlane.xlu1 %73  ;;  %v68_v50 = vpop.xlane.xlu2 %67 }
  0xfa   :  { %v78_v51 = vmul.f32 %v74_v49, %v50_v14  ;;  %v76_v52 = vmul.f32 %v68_v50, %v50_v14 }
  0xfc   :  { %v575_v53 = vpop.eup %574  ;;  %v82_v54 = vadd.f32 1e-05, %v78_v51  ;;  %v80_v55 = vadd.f32 1e-05, %v76_v52 }
  0xfd   :  { %v577_v56 = vpop.eup %576  ;;  %v84_v57 = vmul.f32 %v575_v53, %v79_v47  ;;  %vm90_vm2 = vweird.f32 %v575_v53 }
  0xfe   :  { %v104_v58 = vmul.f32 %v577_v56, %v81_v48  ;;  %578 = vrsqrt.f32 %v82_v54  ;;  %vm110_vm4 = vweird.f32 %v577_v56  ;;  %vm91_vm6 = vmor %vm89_vm5, %vm90_vm2  ;;  %vm119_vm8 = vweird.f32 %v82_v54 }
  0xff   :  { %v85_v59 = vmul.f32 %v575_v53, %v84_v57  ;;  %580 = vrsqrt.f32 %v80_v55  ;;  %vm111_vm7 = vmor %vm109_vm3, %vm110_vm4  ;;  %vm99_vm12 = vweird.f32 %v80_v55  ;;  %vm364_vm2 = vcmask 261120  }
 0x100   :  { %v105_v60 = vmul.f32 %v577_v56, %v104_v58 }
 0x101   :  { %v86_v61 = vmul.f32 0.5, %v85_v59 }
 0x102   :  { %v106_v62 = vmul.f32 0.5, %v105_v60 }
 0x103   :  { %v87_v63 = vsub.f32 1.5, %v86_v61 }
 0x104   :  { %v579_v0 = vpop.eup %578  ;;  %v107_v1 = vsub.f32 1.5, %v106_v62 }
 0x105   :  { %v581_v2 = vpop.eup %580  ;;  %v114_v3 = vmul.f32 %v579_v0, %v82_v54  ;;  %v88_v4 = vmul.f32 %v575_v53, %v87_v63  ;;  %vm120_vm9 = vweird.f32 %v579_v0 }
 0x106   :  { %v94_v5 = vmul.f32 %v581_v2, %v80_v55  ;;  %v108_v6 = vmul.f32 %v577_v56, %v107_v1  ;;  %vm100_vm10 = vweird.f32 %v581_v2  ;;  %vm121_vm11 = vmor %vm119_vm8, %vm120_vm9 }
 0x107   :  { %v115_v7 = vmul.f32 %v579_v0, %v114_v3  ;;  %v92_v8 = vsel %vm91_vm6, %v575_v53, %v88_v4  ;;  %vm101_vm13 = vmor %vm99_vm12, %vm100_vm10 }
 0x108   :  { %v95_v9 = vmul.f32 %v581_v2, %v94_v5  ;;  %v123_v10 = vmul.f32 %v92_v8, %v689_v20  ;;  %v112_v11 = vsel %vm111_vm7, %v577_v56, %v108_v6 }
 0x109   :  { %v116_v12 = vmul.f32 0.5, %v115_v7  ;;  %v125_v13 = vmul.f32 %v112_v11, %v687_v19 }
 0x10a   :  { %v96_v14 = vmul.f32 0.5, %v95_v9  ;;  %539 = vmatmul.msk.f32.vlgmr.msra.gmra.mxu0 %vm31_vm0, %v123_v10  ;;  %v359_v10 = vld [vmem:[%s901_s3 + $0x18] sm:$0xff] }
 0x10b   :  { %v117_v15 = vsub.f32 1.5, %v116_v12  ;;  %541 = vmatmul.msk.f32.vlgmr.msra.gmra.mxu2 %vm31_vm0, %v125_v13  ;;  %389 = vmatpush.msra.mxu1 %v359_v10 }
 0x10c   :  { %v97_v16 = vsub.f32 1.5, %v96_v14  ;;  %559 = vmatpush.msra.mxu3 %v359_v10 }
 0x10d   :  { %v118_v17 = vmul.f32 %v579_v0, %v117_v15 }
 0x10e   :  { %v98_v18 = vmul.f32 %v581_v2, %v97_v16  ;;  %v358_v16 = vld [vmem:[%s901_s3 + $0x10] sm:$0xff] }
 0x10f   :  { %v122_v20 = vsel %vm121_vm11, %v579_v0, %v118_v17  ;;  %390 = vmatpush.msra.mxu1 %v358_v16  ;;  %560 = vmatpush.msra.mxu3 %v358_v16 }
 0x110   :  { %v102_v21 = vsel %vm101_vm13, %v581_v2, %v98_v18  ;;  %v126_v22 = vmul.f32 %v122_v20, %v697_v29 }
 0x111   :  { %v124_v19 = vmul.f32 %v102_v21, %v699_v30 }
 0x113   :  { %540 = vmatmul.msk.f32.gmra.mxu0 %vm31_vm0, %v124_v19  ;;  %542 = vmatmul.msk.f32.gmra.mxu2 %vm31_vm0, %v126_v22  ;;  %v357_v22 = vld [vmem:[%s901_s3 + $0x8] sm:$0xff] }
 0x114   :  { %391 = vmatpush.msra.mxu1 %v357_v22  ;;  %561 = vmatpush.msra.mxu3 %v357_v22 }
 0x187   :  { %v168_v24 = vpop.f32.mrf.mxu0 }
 0x188   :  { %v742_v25 = vadd.f32 %v568_v23, %v168_v24 }
 0x18a   :  { %v745_v26 = vmul.f32 0.70710677, %v742_v25 }
 0x18c   :  { %v188_v27 = vmul.f32 %v745_v26, %v745_v26 }
 0x18e   :  { %v749_v28 = vmin.f32 %v188_v27, 16.0  ;;  %v174_v29 = vpop.f32.mrf.mxu2 }
 0x18f   :  { %v751_v30 = vadd.f32 %v568_v23, %v174_v29  ;;  %v356_v29 = vld [vmem:[%s901_s3] sm:$0xff] }
 0x190   :  { %v190_v31 = vmul.f32 2.1237322e-06, %v749_v28  ;;  %v201_v32 = vmul.f32 3.8918573e-05, %v749_v28  ;;  %v171_v33 = vpop.f32.mrf.mxu0  ;;  %392 = vmatpush.msra.mxu1 %v356_v29  ;;  %562 = vmatpush.msra.mxu3 %v356_v29 }
 0x191   :  { %v756_v34 = vmul.f32 0.70710677, %v751_v30  ;;  %v758_v35 = vadd.f32 %v568_v23, %v171_v33 }
 0x192   :  { %v191_v36 = vadd.f32 0.00028619796, %v190_v31  ;;  %v202_v37 = vadd.f32 0.001143296, %v201_v32 }
 0x193   :  { %v268_v38 = vmul.f32 %v756_v34, %v756_v34  ;;  %v763_v39 = vmul.f32 0.70710677, %v758_v35 }
 0x194   :  { %v192_v40 = vmul.f32 %v191_v36, %v749_v28  ;;  %v203_v41 = vmul.f32 %v202_v37, %v749_v28 }
 0x195   :  { %v767_v42 = vmin.f32 %v268_v38, 16.0  ;;  %v228_v43 = vmul.f32 %v763_v39, %v763_v39 }
 0x196   :  { %v193_v44 = vadd.f32 0.0036580483, %v192_v40  ;;  %v204_v45 = vadd.f32 0.014752088, %v203_v41  ;;  %v177_v46 = vpop.f32.mrf.mxu2 }
 0x197   :  { %v270_v47 = vmul.f32 2.1237322e-06, %v767_v42  ;;  %v281_v48 = vmul.f32 3.8918573e-05, %v767_v42  ;;  %v773_v49 = vmin.f32 %v228_v43, 16.0  ;;  %v776_v51 = vadd.f32 %v568_v23, %v177_v46 }
 0x198   :  { %v205_v50 = vmul.f32 %v204_v45, %v749_v28  ;;  %v194_v52 = vmul.f32 %v193_v44, %v749_v28 }
 0x199   :  { %v282_v53 = vadd.f32 0.001143296, %v281_v48  ;;  %v230_v54 = vmul.f32 2.1237322e-06, %v773_v49  ;;  %v241_v56 = vmul.f32 3.8918573e-05, %v773_v49 }
 0x19a   :  { %v206_v55 = vadd.f32 0.112945676, %v205_v50  ;;  %v271_v57 = vadd.f32 0.00028619796, %v270_v47  ;;  %v784_v62 = vmul.f32 0.70710677, %v776_v51 }
 0x19b   :  { %v283_v58 = vmul.f32 %v282_v53, %v767_v42  ;;  %v231_v60 = vadd.f32 0.00028619796, %v230_v54  ;;  %v242_v61 = vadd.f32 0.001143296, %v241_v56  ;;  %v195_v63 = vadd.f32 0.05243302, %v194_v52 }
 0x19c   :  { %v207_v59 = vmul.f32 %v206_v55, %v749_v28  ;;  %v308_v3 = vmul.f32 %v784_v62, %v784_v62  ;;  %v272_v4 = vmul.f32 %v271_v57, %v767_v42 }
 0x19d   :  { %v284_v0 = vadd.f32 0.014752088, %v283_v58  ;;  %v243_v2 = vmul.f32 %v242_v61, %v773_v49  ;;  %v232_v7 = vmul.f32 %v231_v60, %v773_v49  ;;  %v196_v11 = vmul.f32 %v195_v63, %v749_v28 }
 0x19e   :  { %v208_v1 = vadd.f32 0.4994258, %v207_v59  ;;  %v793_v9 = vmin.f32 %v308_v3, 16.0  ;;  %v273_v17 = vadd.f32 0.0036580483, %v272_v4 }
 0x19f   :  { %v285_v5 = vmul.f32 %v284_v0, %v767_v42  ;;  %v244_v8 = vadd.f32 0.014752088, %v243_v2  ;;  %v233_v20 = vadd.f32 0.0036580483, %v232_v7  ;;  %v197_v19 = vadd.f32 0.18741608, %v196_v11 }
 0x1a0   :  { %v209_v6 = vmul.f32 %v208_v1, %v749_v28  ;;  %v310_v15 = vmul.f32 2.1237322e-06, %v793_v9  ;;  %v321_v21 = vmul.f32 3.8918573e-05, %v793_v9  ;;  %v274_v32 = vmul.f32 %v273_v17, %v767_v42 }
 0x1a1   :  { %v286_v12 = vadd.f32 0.112945676, %v285_v5  ;;  %v245_v14 = vmul.f32 %v244_v8, %v773_v49  ;;  %v234_v33 = vmul.f32 %v233_v20, %v773_v49  ;;  %v198_v38 = vmul.f32 %v197_v19, %v749_v28 }
 0x1a2   :  { %v210_v13 = vadd.f32 1.0, %v209_v6  ;;  %v311_v27 = vadd.f32 0.00028619796, %v310_v15  ;;  %v322_v37 = vadd.f32 0.001143296, %v321_v21 }
 0x1a3   :  { %v287_v18 = vmul.f32 %v286_v12, %v767_v42  ;;  %v246_v24 = vadd.f32 0.112945676, %v245_v14  ;;  %v275_v47 = vadd.f32 0.05243302, %v274_v32  ;;  %v235_v48 = vadd.f32 0.05243302, %v234_v33 }
 0x1a4   :  { %582 = vrcp.f32 %v210_v13  ;;  %v312_v44 = vmul.f32 %v311_v27, %v793_v9  ;;  %v323_v45 = vmul.f32 %v322_v37, %v793_v9  ;;  %v199_v50 = vadd.f32 1.1283791, %v198_v38 }
 0x1a5   :  { %v288_v23 = vadd.f32 0.4994258, %v287_v18  ;;  %v247_v36 = vmul.f32 %v246_v24, %v773_v49  ;;  %v220_v55 = vand.u32 2147483647, %v210_v13  ;;  %v222_v28 = vand.u32 2147483648, %v210_v13 }
 0x1a6   :  { %v324_v54 = vadd.f32 0.014752088, %v323_v45  ;;  %v313_v56 = vadd.f32 0.0036580483, %v312_v44  ;;  %v276_v60 = vmul.f32 %v275_v47, %v767_v42  ;;  %v236_v61 = vmul.f32 %v235_v48, %v773_v49 }
 0x1a7   :  { %v289_v31 = vmul.f32 %v288_v23, %v767_v42  ;;  %v248_v43 = vadd.f32 0.4994258, %v247_v36  ;;  %vm216_vm15 = vweird.f32 %v210_v13  ;;  %v200_v1 = vmul.f32 %v199_v50, %v745_v26 }
 0x1a8   :  { %v325_v59 = vmul.f32 %v324_v54, %v793_v9  ;;  %v223_v2 = vor.u32 1.1754944e-38, %v222_v28  ;;  %vm221_vm1 = vcmp.eq.f32.partialorder %v220_v55, 8.507059e+37  ;;  %v314_v5 = vmul.f32 %v313_v56, %v793_v9 }
 0x1a9   :  { %v817_v40 = vadd.f32 1.0, %v289_v31  ;;  %v249_v53 = vmul.f32 %v248_v43, %v773_v49  ;;  %v277_v8 = vadd.f32 0.18741608, %v276_v60  ;;  %v237_v11 = vadd.f32 0.18741608, %v236_v61 }
 0x1aa   :  { %v583_v41 = vpop.eup %582  ;;  %v326_v6 = vadd.f32 0.112945676, %v325_v59  ;;  %v180_v26 = vmul.f32 0.5, %v742_v25  ;;  %v315_v16 = vadd.f32 0.05243302, %v314_v5  ;;  %v181_v59 = vmul.f32 0.5, %v758_v35 }
 0x1ab   :  { %v212_v46 = vmul.f32 %v583_v41, %v210_v13  ;;  %584 = vrcp.f32 %v817_v40  ;;  %vm217_vm14 = vweird.f32 %v583_v41  ;;  %v823_v58 = vadd.f32 1.0, %v249_v53 }
 0x1ac   :  { %vm218_vm0 = vmor %vm216_vm15, %vm217_vm14  ;;  %v327_v13 = vmul.f32 %v326_v6, %v793_v9  ;;  %v278_v20 = vmul.f32 %v277_v8, %v767_v42  ;;  %v238_v21 = vmul.f32 %v237_v11, %v773_v49  ;;  %vm296_vm3 = vweird.f32 %v817_v40 }
 0x1ad   :  { %v213_v52 = vsub.f32 1.0, %v212_v46  ;;  %586 = vrcp.f32 %v823_v58  ;;  %v300_v19 = vand.u32 2147483647, %v817_v40  ;;  %v302_v25 = vand.u32 2147483648, %v817_v40 }
 0x1ae   :  { %v328_v17 = vadd.f32 0.4994258, %v327_v13  ;;  %v262_v31 = vand.u32 2147483648, %v823_v58  ;;  %v316_v42 = vmul.f32 %v315_v16, %v793_v9  ;;  %v239_v33 = vadd.f32 1.1283791, %v238_v21 }
 0x1af   :  { %v214_v57 = vmul.f32 %v583_v41, %v213_v52  ;;  %v260_v37 = vand.u32 2147483647, %v823_v58  ;;  %vm256_vm7 = vweird.f32 %v823_v58  ;;  %v303_v45 = vor.u32 1.1754944e-38, %v302_v25 }
 0x1b0   :  { %v329_v23 = vmul.f32 %v328_v17, %v793_v9  ;;  %v263_v46 = vor.u32 1.1754944e-38, %v262_v31  ;;  %v317_v47 = vadd.f32 0.18741608, %v316_v42  ;;  %vm301_vm9 = vcmp.eq.f32.partialorder %v300_v19, 8.507059e+37 }
 0x1b1   :  { %v585_v63 = vpop.eup %584  ;;  %v215_v0 = vadd.f32 %v583_v41, %v214_v57  ;;  %vm261_vm10 = vcmp.eq.f32.partialorder %v260_v37, 8.507059e+37  ;;  %v183_v13 = vmul.f32 0.5, %v776_v51 }
 0x1b2   :  { %v292_v3 = vmul.f32 %v585_v63, %v817_v40  ;;  %vm297_vm4 = vweird.f32 %v585_v63  ;;  %v330_v49 = vadd.f32 1.0, %v329_v23  ;;  %v240_v40 = vmul.f32 %v239_v33, %v763_v39 }
 0x1b3   :  { %v219_v4 = vsel %vm218_vm0, %v583_v41, %v215_v0  ;;  %v587_v15 = vpop.eup %586  ;;  %vm846_vm6 = vmor %vm296_vm3, %vm297_vm4  ;;  %v279_v41 = vadd.f32 1.1283791, %v278_v20  ;;  %v318_v28 = vmul.f32 %v317_v47, %v793_v9 }
 0x1b4   :  { %v224_v7 = vsel %vm221_vm1, %v223_v2, %v219_v4  ;;  %v293_v10 = vsub.f32 1.0, %v292_v3  ;;  %v252_v22 = vmul.f32 %v587_v15, %v823_v58  ;;  %vm257_vm5 = vweird.f32 %v587_v15 }
 0x1b5   :  { %v225_v12 = vmul.f32 %v224_v7, %v200_v1  ;;  %588 = vrcp.f32 %v330_v49  ;;  %vm258_vm8 = vmor %vm256_vm7, %vm257_vm5  ;;  %v280_v53 = vmul.f32 %v279_v41, %v756_v34  ;;  %v340_v0 = vand.u32 2147483647, %v330_v49 }
 0x1b6   :  { %v294_v14 = vmul.f32 %v585_v63, %v293_v10  ;;  %v253_v29 = vsub.f32 1.0, %v252_v22  ;;  %v342_v39 = vand.u32 2147483648, %v330_v49  ;;  %vm336_vm12 = vweird.f32 %v330_v49 }
 0x1b7   :  { %v543_v18 = vclamps-f32 %v225_v12, 1.0  ;;  %vm341_vm14 = vcmp.eq.f32.partialorder %v340_v0, 8.507059e+37  ;;  %v182_v7 = vmul.f32 0.5, %v751_v30 }
 0x1b8   :  { %v295_v27 = vadd.f32 %v585_v63, %v294_v14  ;;  %v254_v36 = vmul.f32 %v587_v15, %v253_v29  ;;  %v343_v34 = vor.u32 1.1754944e-38, %v342_v39 }
 0x1b9   :  { %v348_v24 = vadd.f32 1.0, %v543_v18 }
 0x1ba   :  { %v299_v43 = vsel %vm846_vm6, %v585_v63, %v295_v27  ;;  %v255_v44 = vadd.f32 %v587_v15, %v254_v36  ;;  %v319_v63 = vadd.f32 1.1283791, %v318_v28 }
 0x1bb   :  { %v352_v32 = vmul.f32 %v348_v24, %v180_v26  ;;  %v304_v50 = vsel %vm301_vm9, %v303_v45, %v299_v43  ;;  %v589_v55 = vpop.eup %588  ;;  %v627_v24 = vmov 32.0  }
 0x1bc   :  { %v259_v48 = vsel %vm258_vm8, %v587_v15, %v255_v44  ;;  %v305_v56 = vmul.f32 %v304_v50, %v280_v53  ;;  %v332_v57 = vmul.f32 %v589_v55, %v330_v49  ;;  %vm337_vm11 = vweird.f32 %v589_v55 }
 0x1bd   :  { %547 = vmatmul.msk.f32.vlgmr.msra.gmra.mxu1 %vm364_vm2, %v352_v32  ;;  %v264_v52 = vsel %vm261_vm10, %v263_v46, %v259_v48  ;;  %vm338_vm13 = vmor %vm336_vm12, %vm337_vm11  ;;  %v320_v9 = vmul.f32 %v319_v63, %v784_v62  ;;  %v569_v62 = vld [vmem:[%s902_s4] ss:$0 sm:$0xff]  ;;  %590 = vrcp.f32 %v627_v24 }
 0x1be   :  { %v265_v54 = vmul.f32 %v264_v52, %v240_v40  ;;  %v333_v60 = vsub.f32 1.0, %v332_v57  ;;  %v545_v3 = vclamps-f32 %v305_v56, 1.0 }
 0x1c0   :  { %v544_v58 = vclamps-f32 %v265_v54, 1.0  ;;  %v334_v1 = vmul.f32 %v589_v55, %v333_v60  ;;  %v350_v35 = vadd.f32 1.0, %v545_v3 }
 0x1c2   :  { %v349_v61 = vadd.f32 1.0, %v544_v58  ;;  %v335_v4 = vadd.f32 %v589_v55, %v334_v1  ;;  %v354_v10 = vmul.f32 %v350_v35, %v182_v7 }
 0x1c3   :  { %v591_v27 = vpop.eup %590 }
 0x1c4   :  { %v353_v2 = vmul.f32 %v349_v61, %v181_v59  ;;  %v339_v5 = vsel %vm338_vm13, %v589_v55, %v335_v4  ;;  %v421_v25 = vmul.f32 32.0, %v591_v27  ;;  %vm425_vm15 = vweird.f32 %v591_v27  ;;  %v570_v4 = vld [vmem:[%s903_s5] ss:$0 sm:$0xff]  ;;  %s628_s5 = smov [#allocation2]  }
 0x1c5   :  { %v344_v6 = vsel %vm341_vm14, %v343_v34, %v339_v5  ;;  %v571_v5 = vld [vmem:[%s904_s6] ss:$0 sm:$0xff]  ;;  %s525_s6 = sshll.u32 %s628_s5, 4  ;;  %s526_s6 = int_to_ptr.vmem [resolvable:$true] %s525_s6 }
 0x1c6   :  { %548 = vmatmul.msk.f32.vlgmr.msra.gmra.mxu3 %vm364_vm2, %v353_v2  ;;  %v345_v8 = vmul.f32 %v344_v6, %v320_v9  ;;  %v422_v29 = vsub.f32 1.0, %v421_v25 }
 0x1c8   :  { %v546_v11 = vclamps-f32 %v345_v8, 1.0  ;;  %v423_v31 = vmul.f32 %v591_v27, %v422_v29 }
 0x1ca   :  { %v351_v12 = vadd.f32 1.0, %v546_v11  ;;  %v424_v42 = vadd.f32 %v591_v27, %v423_v31 }
 0x1cc   :  { %v355_v14 = vmul.f32 %v351_v12, %v183_v13  ;;  %v426_v49 = vsel %vm425_vm15, %v591_v27, %v424_v42 }
 0x1ce   :  { %549 = vmatmul.msk.f32.gmra.mxu3 %vm364_vm2, %v354_v10 }
 0x1d6   :  { %550 = vmatmul.msk.f32.gmra.mxu3 %vm364_vm2, %v355_v14 }
 0x23a   :  { %v394_v15 = vpop.f32.mrf.mxu1 }
 0x23b   :  { %v395_v26 = vadd.f32 %v569_v62, %v394_v15 }
 0x23d   :  { %v408_v16 = vsel %vm364_vm2, %v395_v26, 0.0 }
 0x23e   :  { %409 = vadd.xlane.f32.xlu2 %v408_v16 }
 0x249   :  { %v397_v30 = vpop.f32.mrf.mxu3 }
 0x24a   :  { %v398_v17 = vadd.f32 %v569_v62, %v397_v30 }
 0x24c   :  { %v411_v18 = vsel %vm364_vm2, %v398_v17, 0.0 }
 0x24d   :  { %412 = vadd.xlane.f32.xlu0 %v411_v18 }
 0x251   :  { %v400_v20 = vpop.f32.mrf.mxu3 }
 0x252   :  { %v401_v21 = vadd.f32 %v569_v62, %v400_v20 }
 0x254   :  { %v414_v51 = vsel %vm364_vm2, %v401_v21, 0.0 }
 0x255   :  { %415 = vadd.xlane.f32.xlu1 %v414_v51 }
 0x259   :  { %v403_v22 = vpop.f32.mrf.mxu3 }
 0x25a   :  { %v404_v19 = vadd.f32 %v569_v62, %v403_v22 }
 0x25c   :  { %v417_v23 = vsel %vm364_vm2, %v404_v19, 0.0 }
 0x25d   :  { %418 = vadd.xlane.f32.xlu2 %v417_v23 }
 0x2b1   :  { %v410_v32 = vpop.xlane.xlu2 %409 }
 0x2b2   :  { %v427_v33 = vmul.f32 %v426_v49, %v410_v32 }
 0x2b4   :  { %v431_v36 = vsub.f32 %v395_v26, %v427_v33 }
 0x2b6   :  { %v435_v37 = vmul.f32 %v431_v36, %v431_v36 }
 0x2b8   :  { %v439_v38 = vsel %vm364_vm2, %v435_v37, 0.0 }
 0x2b9   :  { %440 = vadd.xlane.f32.xlu0 %v439_v38 }
 0x2c0   :  { %v413_v41 = vpop.xlane.xlu0 %412 }
 0x2c1   :  { %v428_v43 = vmul.f32 %v426_v49, %v413_v41 }
 0x2c3   :  { %v432_v44 = vsub.f32 %v398_v17, %v428_v43 }
 0x2c5   :  { %v436_v45 = vmul.f32 %v432_v44, %v432_v44 }
 0x2c7   :  { %v442_v46 = vsel %vm364_vm2, %v436_v45, 0.0 }
 0x2c8   :  { %v416_v47 = vpop.xlane.xlu1 %415  ;;  %443 = vadd.xlane.f32.xlu1 %v442_v46 }
 0x2c9   :  { %v429_v40 = vmul.f32 %v426_v49, %v416_v47 }
 0x2cb   :  { %v873_v48 = vsub.f32 %v401_v21, %v429_v40 }
 0x2cd   :  { %v437_v50 = vmul.f32 %v873_v48, %v873_v48 }
 0x2cf   :  { %v445_v52 = vsel %vm364_vm2, %v437_v50, 0.0 }
 0x2d0   :  { %v419_v53 = vpop.xlane.xlu2 %418  ;;  %446 = vadd.xlane.f32.xlu2 %v445_v52 }
 0x2d1   :  { %v430_v54 = vmul.f32 %v426_v49, %v419_v53 }
 0x2d3   :  { %v878_v55 = vsub.f32 %v404_v19, %v430_v54 }
 0x2d5   :  { %v438_v28 = vmul.f32 %v878_v55, %v878_v55 }
 0x2d7   :  { %v448_v56 = vsel %vm364_vm2, %v438_v28, 0.0 }
 0x2d8   :  { %449 = vadd.xlane.f32.xlu0 %v448_v56 }
 0x32c   :  { %v441_v57 = vpop.xlane.xlu0 %440 }
 0x32d   :  { %v451_v58 = vmul.f32 %v441_v57, %v426_v49 }
 0x32f   :  { %v455_v59 = vadd.f32 1e-05, %v451_v58 }
 0x331   :  { %592 = vrsqrt.f32 %v455_v59  ;;  %vm465_vm1 = vweird.f32 %v455_v59 }
 0x337   :  { %v593_v60 = vpop.eup %592 }
 0x338   :  { %v460_v61 = vmul.f32 %v593_v60, %v455_v59  ;;  %vm466_vm0 = vweird.f32 %v593_v60 }
 0x339   :  { %vm467_vm3 = vmor %vm465_vm1, %vm466_vm0 }
 0x33a   :  { %v461_v63 = vmul.f32 %v593_v60, %v460_v61 }
 0x33b   :  { %v444_v1 = vpop.xlane.xlu1 %443 }
 0x33c   :  { %v462_v0 = vmul.f32 0.5, %v461_v63  ;;  %v452_v3 = vmul.f32 %v444_v1, %v426_v49 }
 0x33e   :  { %v463_v39 = vsub.f32 1.5, %v462_v0  ;;  %v456_v9 = vadd.f32 1e-05, %v452_v3 }
 0x340   :  { %v464_v2 = vmul.f32 %v593_v60, %v463_v39  ;;  %594 = vrsqrt.f32 %v456_v9  ;;  %vm475_vm5 = vweird.f32 %v456_v9 }
 0x342   :  { %v468_v34 = vsel %vm467_vm3, %v593_v60, %v464_v2 }
 0x343   :  { %v499_v35 = vmul.f32 %v468_v34, %v431_v36  ;;  %v447_v8 = vpop.xlane.xlu2 %446 }
 0x344   :  { %v453_v10 = vmul.f32 %v447_v8, %v426_v49 }
 0x345   :  { %v506_v6 = vmul.f32 %v570_v4, %v499_v35 }
 0x346   :  { %v595_v11 = vpop.eup %594  ;;  %v457_v12 = vadd.f32 1e-05, %v453_v10 }
 0x347   :  { %v513_v7 = vadd.f32 %v571_v5, %v506_v6  ;;  %v470_v13 = vmul.f32 %v595_v11, %v456_v9  ;;  %vm476_vm4 = vweird.f32 %v595_v11 }
 0x348   :  { %596 = vrsqrt.f32 %v457_v12  ;;  %vm477_vm6 = vmor %vm475_vm5, %vm476_vm4  ;;  %vm485_vm8 = vweird.f32 %v457_v12 }
 0x349   :  { %517 = vst.msk [vmem:[#allocation2] sm:$0xff] %vm364_vm2, %v513_v7  ;;  %v471_v14 = vmul.f32 %v595_v11, %v470_v13 }
 0x34b   :  { %v472_v62 = vmul.f32 0.5, %v471_v14  ;;  %v450_v15 = vpop.xlane.xlu0 %449 }
 0x34c   :  { %v454_v26 = vmul.f32 %v450_v15, %v426_v49 }
 0x34d   :  { %v473_v16 = vsub.f32 1.5, %v472_v62 }
 0x34e   :  { %v597_v30 = vpop.eup %596  ;;  %v458_v17 = vadd.f32 1e-05, %v454_v26 }
 0x34f   :  { %v474_v18 = vmul.f32 %v595_v11, %v473_v16  ;;  %v480_v20 = vmul.f32 %v597_v30, %v457_v12  ;;  %vm486_vm7 = vweird.f32 %v597_v30 }
 0x350   :  { %598 = vrsqrt.f32 %v458_v17  ;;  %vm487_vm9 = vmor %vm485_vm8, %vm486_vm7  ;;  %vm495_vm11 = vweird.f32 %v458_v17 }
 0x351   :  { %v478_v21 = vsel %vm477_vm6, %v595_v11, %v474_v18  ;;  %v481_v51 = vmul.f32 %v597_v30, %v480_v20 }
 0x352   :  { %v500_v22 = vmul.f32 %v478_v21, %v432_v44 }
 0x353   :  { %v482_v19 = vmul.f32 0.5, %v481_v51 }
 0x354   :  { %v507_v23 = vmul.f32 %v570_v4, %v500_v22 }
 0x355   :  { %v483_v24 = vsub.f32 1.5, %v482_v19 }
 0x356   :  { %v599_v27 = vpop.eup %598  ;;  %v514_v25 = vadd.f32 %v571_v5, %v507_v23 }
 0x357   :  { %v484_v29 = vmul.f32 %v597_v30, %v483_v24  ;;  %v490_v31 = vmul.f32 %v599_v27, %v458_v17  ;;  %vm496_vm10 = vweird.f32 %v599_v27 }
 0x358   :  { %518 = vst.msk [vmem:[#allocation2 + $0x8] sm:$0xff] %vm364_vm2, %v514_v25  ;;  %vm497_vm12 = vmor %vm495_vm11, %vm496_vm10 }
 0x359   :  { %v488_v42 = vsel %vm487_vm9, %v597_v30, %v484_v29  ;;  %v491_v49 = vmul.f32 %v599_v27, %v490_v31 }
 0x35a   :  { %v501_v32 = vmul.f32 %v488_v42, %v873_v48 }
 0x35b   :  { %v492_v33 = vmul.f32 0.5, %v491_v49 }
 0x35c   :  { %v508_v36 = vmul.f32 %v570_v4, %v501_v32 }
 0x35d   :  { %v493_v37 = vsub.f32 1.5, %v492_v33 }
 0x35e   :  { %v515_v38 = vadd.f32 %v571_v5, %v508_v36 }
 0x35f   :  { %v494_v41 = vmul.f32 %v599_v27, %v493_v37 }
 0x360   :  { %519 = vst.msk [vmem:[#allocation2 + $0x10] sm:$0xff] %vm364_vm2, %v515_v38 }
 0x361   :  { %v498_v43 = vsel %vm497_vm12, %v599_v27, %v494_v41 }
 0x362   :  { %v502_v44 = vmul.f32 %v498_v43, %v878_v55 }
 0x364   :  { %v509_v45 = vmul.f32 %v570_v4, %v502_v44 }
 0x366   :  { %v516_v46 = vadd.f32 %v571_v5, %v509_v45 }
 0x368   :  { %520 = vst.msk [vmem:[#allocation2 + $0x18] sm:$0xff] %vm364_vm2, %v516_v46 }
 0x369   :  { %533 = dma.vmem_to_hbm [thread:$0]  %s526_s6, 512, %s528_s14, [#allocation3], %s629_s15, %s629_s15, %s630_s16  }
 0x36a   :  { %624 = dma.done.wait [#allocation3], 512  }
 0x36b   :  { %625 = vsyncadd [#allocation3], 4294966784 }
 0x36c   :  { %538 = vsyncpa [#allocation3], 1 }

</bundles_post_ra>
